<compile_context>
chip_gen: v5e
topology: v5e:2x2
jax: 0.10.0
libtpu: 0.0.40
codegen_flags: <defaults>
</compile_context>

<pallas_src>
import functools
import math

import numpy as np
import jax
import jax.numpy as jnp
from jax.experimental import pallas as pl
from jax.experimental.pallas import tpu as pltpu

SCALE = 64.0          # power of two -> pre-cast fold into bf16 weights is exact
MARGIN = 0.3
_COS_M = math.cos(MARGIN)
_SIN_M = math.sin(MARGIN)
_NORM_EPS = 1e-12     # F.normalize default eps
_CLIP_EPS = 1e-07
_CLIP_HI = SCALE * (1.0 - _CLIP_EPS)   # clip threshold in the pre-scaled domain


def _round_up(x, m):
    return ((x + m - 1) // m) * m


_VMEM_LIMIT_CACHE = None


def _vmem_limit_bytes():
    """Generation-aware scoped-VMEM limit with headroom for compiler scratch:
    ~48 MiB on a 64 MiB v7x TensorCore, ~96 MiB on 128 MiB v5e/v6e parts."""
    global _VMEM_LIMIT_CACHE
    if _VMEM_LIMIT_CACHE is None:
        try:
            cap = int(pltpu.get_tpu_info().vmem_capacity_bytes)
        except Exception:
            cap = 64 * 1024 * 1024   # conservative fallback (v7x per-core VMEM)
        _VMEM_LIMIT_CACHE = max(32 * 1024 * 1024,
                                min(cap - 16 * 1024 * 1024, (3 * cap) // 4))
    return _VMEM_LIMIT_CACHE


def _select_tiles(B, N, Kp, block_b, block_n, out_bytes, vmem_limit):
    """Pick (tb, tn) tiles; shrink tn then tb if the double-buffered working
    set would exceed ~60% of the scoped VMEM budget."""
    tb = min(block_b, _round_up(B, 8))
    tn = min(block_n, _round_up(N, 128))
    budget = int(0.6 * vmem_limit)

    def fits(tb_, tn_):
        # double-buffered: features + W^T + targets + output tile
        return 2 * (tb_ * Kp * 2 + Kp * tn_ * 2 + tb_ * 4 + tb_ * tn_ * out_bytes) <= budget

    while not fits(tb, tn) and tn > 128:
        tn = max(128, ((tn // 2) // 128) * 128)
    while not fits(tb, tn) and tb > 8:
        tb = max(8, ((tb // 2) // 8) * 8)
    # TODO(synk): for extremely large K (>~8k) add a K reduction grid axis
    # ("arbitrary", last) with an f32 VMEM accumulator instead of shrinking tn.
    return tb, tn


def arc_margin_kernel(feat_ref, wt_ref, tgt_ref, out_ref):
    # MXU: (TB, Kp) bf16 @ (Kp, TN) bf16 -> f32.  Weight columns are already
    # L2-normalized and pre-scaled by SCALE, so this is SCALE * cos(theta).
    cs = jnp.dot(feat_ref[...], wt_ref[...], preferred_element_type=jnp.float32)
    cs = jnp.clip(cs, -_CLIP_HI, _CLIP_HI)                      # SCALE*clip(cos)

    # SCALE*sin(theta) = sqrt(SCALE^2 - cs^2), >= 0 since theta in (0, pi).
    ss = jnp.sqrt(SCALE * SCALE - cs * cs)

    tb, tn = out_ref.shape
    col0 = pl.program_id(0) * tn                                 # class-tile offset
    class_ids = col0 + jax.lax.broadcasted_iota(jnp.int32, (tb, tn), 1)
    onehot = class_ids == tgt_ref[...]                           # (TB,1) -> (TB,TN)

    with_margin = cs * _COS_M - ss * _SIN_M                      # SCALE*cos(theta+m)
    out_ref[...] = jnp.where(onehot, with_margin, cs).astype(out_ref.dtype)


def prepare_arcface_weights(weights):
    """One-shot weight prep (hoist & cache this for frozen / inference weights).

    Returns W^T of shape (K, N), each class row L2-normalized (f32 rsqrt,
    F.normalize eps) and pre-scaled by SCALE, cast to bf16.  SCALE=64 is a
    power of two so folding it before the bf16 cast is numerically exact.
    """
    w32 = weights.astype(jnp.float32)
    inv_norm = jax.lax.rsqrt(
        jnp.maximum(jnp.sum(w32 * w32, axis=1, keepdims=True),
                    _NORM_EPS * _NORM_EPS))
    return jnp.transpose(w32 * (SCALE * inv_norm)).astype(jnp.bfloat16)   # (K, N)


def _arc_margin_core(features, w_t, targets, *, block_b, block_n, out_dtype):
    B, K = features.shape
    K2, N = w_t.shape
    assert K == K2, (K, K2)

    Kp = _round_up(K, 128)                     # contraction dim alignment (exact)
    out_bytes = np.dtype(out_dtype).itemsize
    vmem_limit = _vmem_limit_bytes()
    tb, tn = _select_tiles(B, N, Kp, block_b, block_n, out_bytes, vmem_limit)

    Bp = _round_up(B, tb)
    Np = _round_up(N, tn)

    feats = features.astype(jnp.bfloat16)
    if (Bp, Kp) != (B, K):
        feats = jnp.pad(feats, ((0, Bp - B), (0, Kp - K)))
    w_pad = w_t
    if (Kp, Np) != (K, N):
        w_pad = jnp.pad(w_pad, ((0, Kp - K), (0, Np - N)))
    tgt = targets.astype(jnp.int32)
    if Bp != B:
        tgt = jnp.pad(tgt, ((0, Bp - B),))
    tgt2d = tgt.reshape(Bp, 1)

    # Class axis leads: megacore splits classes (each core streams only half of
    # W^T), and the W^T block stays resident across the fast inner batch axis.
    grid = (Np // tn, Bp // tb)

    out = pl.pallas_call(
        arc_margin_kernel,
        out_shape=jax.ShapeDtypeStruct((Bp, Np), out_dtype),
        grid_spec=pltpu.PrefetchScalarGridSpec(
            num_scalar_prefetch=0,
            grid=grid,
            in_specs=[
                pl.BlockSpec((tb, Kp), lambda nj, bi: (bi, 0)),   # features (bf16)
                pl.BlockSpec((Kp, tn), lambda nj, bi: (0, nj)),   # s*W^T/||w|| (bf16)
                pl.BlockSpec((tb, 1), lambda nj, bi: (bi, 0)),    # targets  (i32)
            ],
            out_specs=pl.BlockSpec((tb, tn), lambda nj, bi: (bi, nj)),
        ),
        compiler_params=pltpu.CompilerParams(
            dimension_semantics=("parallel", "parallel"),
            vmem_limit_bytes=vmem_limit,
        ),
    )(feats, w_pad, tgt2d)

    return out[:B, :N]


@functools.partial(jax.jit, static_argnames=("block_b", "block_n", "out_dtype"))
def arc_margin_product(features, weights, targets, *,
                       block_b=256, block_n=2048, out_dtype=jnp.float32):
    """ArcMarginProduct.forward(features, targets) with raw (N, K) weights.

    features: (B, K) float, weights: (N, K) float, targets: (B,) int.
    Returns (B, N) logits (f32 by default; pass out_dtype=jnp.bfloat16 if the
    downstream loss accepts half-width logits to halve the output writeback).
    """
    w_t = prepare_arcface_weights(weights)     # XLA fuses scale into transpose+cast
    return _arc_margin_core(features, w_t, targets,
                            block_b=block_b, block_n=block_n, out_dtype=out_dtype)


@functools.partial(jax.jit, static_argnames=("block_b", "block_n", "out_dtype"))
def arc_margin_product_prepared(features, w_t, targets, *,
                                block_b=256, block_n=2048, out_dtype=jnp.float32):
    """Same forward, but takes prepare_arcface_weights(weights) directly so the
    transpose/normalize/cast pass can be cached for frozen weights."""
    return _arc_margin_core(features, w_t, targets,
                            block_b=block_b, block_n=block_n, out_dtype=out_dtype)


def _reference(features, weights, targets):
    """Pure-JAX reference of the module forward, with the matmul inputs
    quantized to bf16 the same way the kernel does (the inv-norm fold happens
    before the cast; SCALE=64 is a power of two so its fold is exact)."""
    w32 = weights.astype(jnp.float32)
    inv_norm = jax.lax.rsqrt(
        jnp.maximum(jnp.sum(w32 * w32, axis=1, keepdims=True),
                    _NORM_EPS * _NORM_EPS))
    w_q = (w32 * inv_norm).astype(jnp.bfloat16).astype(jnp.float32)
    f_q = features.astype(jnp.bfloat16).astype(jnp.float32)
    cos = jnp.clip(f_q @ w_q.T, -1.0 + _CLIP_EPS, 1.0 - _CLIP_EPS)
    arc = jnp.arccos(cos)
    arc = arc + jax.nn.one_hot(targets, weights.shape[0], dtype=jnp.float32) * MARGIN
    return jnp.cos(arc) * SCALE


if __name__ == "__main__":
    key = jax.random.PRNGKey(0)

    # --- Check 1: tiny shapes consistent with the module (single grid cell) ---
    in_features, out_features, batch = 32, 16, 8
    k_feat, k_w, k_tgt, key = jax.random.split(key, 4)
    xavier_std = math.sqrt(2.0 / (in_features + out_features))
    weights = xavier_std * jax.random.normal(k_w, (out_features, in_features), jnp.float32)
    features = jax.random.normal(k_feat, (batch, in_features), jnp.float32)
    targets = jax.random.randint(k_tgt, (batch,), 0, out_features, dtype=jnp.int32)

    logits = arc_margin_product(features, weights, targets)
    jax.block_until_ready(logits)
    ref = _reference(features, weights, targets)
    assert logits.shape == (batch, out_features)
    assert logits.dtype == jnp.float32
    assert bool(jnp.allclose(logits, ref, atol=5e-3, rtol=1e-3)), (
        float(jnp.max(jnp.abs(logits - ref))))

    # --- Check 2: multi-tile grid (exercises class-tile offsets, W residency,
    #     padding of B/N/K and the cached-weight path) ---
    in_features2, out_features2, batch2 = 32, 300, 24
    k_feat, k_w, k_tgt, key = jax.random.split(key, 4)
    xavier_std2 = math.sqrt(2.0 / (in_features2 + out_features2))
    weights2 = xavier_std2 * jax.random.normal(k_w, (out_features2, in_features2), jnp.float32)
    features2 = jax.random.normal(k_feat, (batch2, in_features2), jnp.float32)
    targets2 = jax.random.randint(k_tgt, (batch2,), 0, out_features2, dtype=jnp.int32)

    w_prepped = prepare_arcface_weights(weights2)
    logits2 = arc_margin_product_prepared(features2, w_prepped, targets2,
                                          block_b=8, block_n=128)
    jax.block_until_ready(logits2)
    ref2 = _reference(features2, weights2, targets2)
    assert logits2.shape == (batch2, out_features2)
    assert bool(jnp.allclose(logits2, ref2, atol=5e-3, rtol=1e-3)), (
        float(jnp.max(jnp.abs(logits2 - ref2))))

    print("KERNEL_OK")
</pallas_src>

<mosaic_0001>
module attributes {stable_mosaic.version = 11 : i64} {
  func.func @arc_margin_kernel(%arg0: i32, %arg1: i32, %arg2: memref<8x128xbf16, #tpu.memory_space<vmem>>, %arg3: memref<128x128xbf16, #tpu.memory_space<vmem>>, %arg4: memref<8x1xi32, #tpu.memory_space<vmem>>, %arg5: memref<8x128xf32, #tpu.memory_space<vmem>>) attributes {dimension_semantics = [#tpu.dimension_semantics<parallel>, #tpu.dimension_semantics<parallel>], iteration_bounds = array<i64: 1, 1>, scalar_prefetch = 0 : i64, scratch_operands = 0 : i64, tpu.core_type = #tpu.core_type<tc>, window_params = [{transform_indices = @transform_0, window_bounds = array<i64: 8, 128>}, {transform_indices = @transform_1, window_bounds = array<i64: 128, 128>}, {transform_indices = @transform_2, window_bounds = array<i64: 8, 1>}, {transform_indices = @transform_3, window_bounds = array<i64: 8, 128>}]} {
    %c0 = arith.constant 0 : index
    %c0_0 = arith.constant 0 : index
    %0 = vector.load %arg2[%c0, %c0_0] : memref<8x128xbf16, #tpu.memory_space<vmem>>, vector<8x128xbf16>
    %c0_1 = arith.constant 0 : index
    %c0_2 = arith.constant 0 : index
    %1 = vector.load %arg3[%c0_1, %c0_2] : memref<128x128xbf16, #tpu.memory_space<vmem>>, vector<128x128xbf16>
    %cst = arith.constant dense<0.000000e+00> : vector<8x128xf32>
    %2 = tpu.matmul %0, %1, %cst {dimension_numbers = #tpu.dot_dimension_numbers<[1], [0], [0], [1], [0, 0, 1, 1], [], []>} : vector<8x128xbf16>, vector<128x128xbf16>, vector<8x128xf32> -> vector<8x128xf32>
    %cst_3 = arith.constant -63.9999924 : f32
    %cst_4 = arith.constant 63.9999924 : f32
    %3 = vector.broadcast %cst_3 : f32 to vector<8x128xf32>
    %4 = arith.maximumf %3, %2 : vector<8x128xf32>
    %5 = vector.broadcast %cst_4 : f32 to vector<8x128xf32>
    %6 = arith.minimumf %5, %4 : vector<8x128xf32>
    %7 = arith.mulf %6, %6 : vector<8x128xf32>
    %cst_5 = arith.constant 4.096000e+03 : f32
    %8 = vector.broadcast %cst_5 : f32 to vector<8x128xf32>
    %9 = arith.subf %8, %7 : vector<8x128xf32>
    %10 = math.sqrt %9 : vector<8x128xf32>
    %c128_i32 = arith.constant 128 : i32
    %11 = arith.muli %arg0, %c128_i32 : i32
    %12 = tpu.iota {dimensions = array<i32: 1>} : vector<8x128xi32>
    %13 = vector.broadcast %11 : i32 to vector<8x128xi32>
    %14 = arith.addi %13, %12 : vector<8x128xi32>
    %c0_6 = arith.constant 0 : index
    %c0_7 = arith.constant 0 : index
    %15 = vector.load %arg4[%c0_6, %c0_7] : memref<8x1xi32, #tpu.memory_space<vmem>>, vector<8x1xi32>
    %16 = vector.broadcast %15 : vector<8x1xi32> to vector<8x128xi32>
    %17 = arith.cmpi eq, %14, %16 : vector<8x128xi32>
    %cst_8 = arith.constant 0.955336511 : f32
    %18 = vector.broadcast %cst_8 : f32 to vector<8x128xf32>
    %19 = arith.mulf %6, %18 : vector<8x128xf32>
    %cst_9 = arith.constant 0.295520216 : f32
    %20 = vector.broadcast %cst_9 : f32 to vector<8x128xf32>
    %21 = arith.mulf %10, %20 : vector<8x128xf32>
    %22 = arith.subf %19, %21 : vector<8x128xf32>
    %23 = arith.select %17, %22, %6 : vector<8x128xi1>, vector<8x128xf32>
    %c0_10 = arith.constant 0 : index
    %c0_11 = arith.constant 0 : index
    %24 = vector.load %arg5[%c0_10, %c0_11] : memref<8x128xf32, #tpu.memory_space<vmem>>, vector<8x128xf32>
    tpu.vector_store %arg5[%c0_10, %c0_11], %23 {strides = array<i32>} : memref<8x128xf32, #tpu.memory_space<vmem>>, vector<8x128xf32>,
    return
  }
  func.func @transform_0(%arg0: i32, %arg1: i32) -> (i32, i32) {
    %c0_i32 = arith.constant 0 : i32
    %c0_i32_0 = arith.constant 0 : i32
    return %arg1, %c0_i32 : i32, i32
  }
  func.func @transform_1(%arg0: i32, %arg1: i32) -> (i32, i32) {
    %c0_i32 = arith.constant 0 : i32
    %c0_i32_0 = arith.constant 0 : i32
    return %c0_i32, %arg0 : i32, i32
  }
  func.func @transform_2(%arg0: i32, %arg1: i32) -> (i32, i32) {
    %c0_i32 = arith.constant 0 : i32
    %c0_i32_0 = arith.constant 0 : i32
    return %arg1, %c0_i32 : i32, i32
  }
  func.func @transform_3(%arg0: i32, %arg1: i32) -> (i32, i32) {
    %c0_i32 = arith.constant 0 : i32
    return %arg1, %arg0 : i32, i32
  }
}

</mosaic_0001>

<bundles_post_ra>
// kernel: arc_margin_product.1
= control target key start
LH: loop header
LB: loop body
LE: loop exit
PB: predicated region body
PF: predicated region fallthrough
CT: control target
= control target key end

     0   :  { %v212_v2 = vmov 0   ;;  %s267_s0 = inlined_call_operand.vmem [shape: bf16[8,128], index: 0, kind: input, shape index: {}]   ;;  %s268_s1 = inlined_call_operand.vmem [shape: bf16[128,128], index: 1, kind: input, shape index: {}]   ;;  %s269_s2 = inlined_call_operand.vmem [shape: s32[8,1], index: 2, kind: input, shape index: {}]   ;;  %s270_s3 = inlined_call_operand.hbm [shape: f32[8,128], index: 3, kind: output, shape index: {}]  }
   0x1   :  { %v180_v0 = vld [vmem:[%s268_s1 + $0x38] sm:$0xff]  ;;  %v179_v1 = vld [vmem:[%s268_s1 + $0x30] sm:$0xff]  ;;  %183 = vset.pattern.permute.xlu0 %v212_v2  ;;  %v114_v3 = vld [vmem:[%s269_s2] sm:$0xff] }
   0x2   :  { %80 = vmatpush.bf16.msra.mxu0 %v180_v0 }
   0x3   :  { %8 = vsyncpa [#allocation3], 0  ;;  %116 = vperm.xlu0 %183, %v114_v3   ;;  %v178_v4 = vld [vmem:[%s268_s1 + $0x28] sm:$0xff]  ;;  %v177_v5 = vld [vmem:[%s268_s1 + $0x20] sm:$0xff]  ;;  %v110_v21 = vlaneseq  ;;  %s131_s6 = sshll.u32 %s270_s3, 4  ;;  %s132_s6 = int_to_ptr.hbm [resolvable:$true] %s131_s6 }
   0x4   :  { %v176_v6 = vld [vmem:[%s268_s1 + $0x18] sm:$0xff]  ;;  %v175_v7 = vld [vmem:[%s268_s1 + $0x10] sm:$0xff]  ;;  %v174_v8 = vld [vmem:[%s268_s1 + $0x8] sm:$0xff] }
   0x5   :  { %v173_v9 = vld [vmem:[%s268_s1] sm:$0xff]  ;;  %v111_v25 = vand.u32 127, %v110_v21 }
   0x6   :  { %81 = vmatpush.bf16.msra.mxu0 %v179_v1  ;;  %v15_v10 = vld [vmem:[%s267_s0] sm:$0xf]  ;;  %s213_s0 = smov [#allocation2]  }
   0x7   :  { %s129_s1 = sshll.u32 %s213_s0, 4  ;;  %s130_s1 = int_to_ptr.vmem [resolvable:$true] %s129_s1 }
   0xa   :  { %82 = vmatpush.bf16.msra.mxu0 %v178_v4 }
   0xe   :  { %83 = vmatpush.bf16.msra.mxu0 %v177_v5 }
  0x12   :  { %84 = vmatpush.bf16.msra.mxu0 %v176_v6 }
  0x16   :  { %85 = vmatpush.bf16.msra.mxu0 %v175_v7 }
  0x1a   :  { %86 = vmatpush.bf16.msra.mxu0 %v174_v8 }
  0x1e   :  { %87 = vmatpush.bf16.msra.mxu0 %v173_v9 }
  0x21   :  { %88 = vmatmul.bf16.vlgmr.msra.gmra.mxu0 %v15_v10 }
  0x75   :  { %v117_v27 = vpop.permute.xlu0 %116 }
  0x76   :  { %vm118_vm2 = vcmp.eq.s32.totalorder %v111_v25, %v117_v27 }
  0x9e   :  { %v89_v11 = vpop.f32.mrf.mxu0 }
  0x9f   :  { %v172_v12 = vclamps-f32 %v89_v11, 63.999992 }
  0xa1   :  { %v95_v13 = vmul.f32 %v172_v12, %v172_v12  ;;  %v119_v29 = vmul.f32 0.9553365, %v172_v12 }
  0xa3   :  { %v96_v14 = vsub.f32 4096.0, %v95_v13 }
  0xa5   :  { %184 = vrsqrt.f32 %v96_v14  ;;  %vm104_vm0 = vcmp.eq.f32.partialorder %v96_v14, inf  ;;  %v107_v24 = vand.u32 2147483648, %v96_v14  ;;  %vm106_vm1 = vcmp.eq.f32.partialorder %v96_v14, 0.0 }
  0xa6   :  { %v91_v15 = vpop.f32.mrf.mxu0 }
  0xab   :  { %v185_v16 = vpop.eup %184 }
  0xac   :  { %v98_v17 = vmul.f32 %v185_v16, %v96_v14 }
  0xae   :  { %v99_v18 = vmul.f32 %v185_v16, %v98_v17 }
  0xb0   :  { %v100_v19 = vmul.f32 0.5, %v99_v18 }
  0xb2   :  { %v101_v20 = vsub.f32 1.5, %v100_v19 }
  0xb4   :  { %v102_v22 = vmul.f32 %v185_v16, %v101_v20 }
  0xb6   :  { %v103_v23 = vmul.f32 %v102_v22, %v96_v14 }
  0xb8   :  { %v105_v26 = vsel %vm104_vm0, %v96_v14, %v103_v23 }
  0xb9   :  { %v108_v28 = vsel %vm106_vm1, %v107_v24, %v105_v26 }
  0xba   :  { %v120_v30 = vmul.f32 0.29552022, %v108_v28 }
  0xbc   :  { %v121_v31 = vsub.f32 %v119_v29, %v120_v30 }
  0xbe   :  { %v122_v32 = vsel %vm118_vm2, %v121_v31, %v172_v12 }
  0xbf   :  { %123 = vst [vmem:[#allocation2] sm:$0xff] %v122_v32 }
  0xc0   :  { %134 = dma.vmem_to_hbm [thread:$0]  %s130_s1, 128, %s132_s6, [#allocation3]  }
  0xc1   :  { %210 = dma.done.wait [#allocation3], 128  }
  0xc2   :  { %211 = vsyncadd [#allocation3], 4294967168 }
  0xc3   :  { %139 = vsyncpa [#allocation3], 1 }

</bundles_post_ra>
